<compile_context>
chip_gen: v7x
topology: tpu7x:2x2x1
jax: 0.10.0
libtpu: 0.0.40
codegen_flags: <defaults>
</compile_context>

<pallas_src>
import functools

import jax
import jax.numpy as jnp
from jax.experimental import pallas as pl
from jax.experimental.pallas import tpu as pltpu

NUM_LAYERS = 5


def _round_up(x, m):
    return ((x + m - 1) // m) * m


def emergence_kernel(x_ref, wt_ref, b_ref, p_ref, out_ref, act_ref):
    # x_ref  : (TB, D)  f32   input activations (read once, at l == 0)
    # wt_ref : (D, D)   bf16  this layer's pre-transposed weight (W.T)
    # b_ref  : (1, D)   f32   this layer's bias
    # p_ref  : (1, D)   f32   pattern_recognition vector as a row
    # out_ref: (TB, 1)  f32   final projection (written at l == L-1)
    # act_ref: (TB, D)  f32   persistent activation scratch
    l = pl.program_id(1)

    @pl.when(l == 0)
    def _init():
        act_ref[...] = x_ref[...]

    # bf16 x bf16 -> f32 accumulation on the MXU; bias/ReLU in f32 on the VPU.
    y = jnp.dot(
        act_ref[...].astype(wt_ref.dtype),
        wt_ref[...],
        preferred_element_type=jnp.float32,
    )
    act_ref[...] = jnp.maximum(y + b_ref[...], 0.0)

    @pl.when(l == pl.num_programs(1) - 1)
    def _finalize():
        # VPU multiply + lane reduction instead of an N=1 MXU matmul.
        out_ref[...] = jnp.sum(act_ref[...] * p_ref[...], axis=-1, keepdims=True)


@functools.partial(jax.jit, static_argnames=("weights_dtype",))
def emergence_patterns(x, wt_stack, b_stack, pattern, *, weights_dtype=jnp.bfloat16):
    """x: (B, D) f32; wt_stack: (L, D, D); b_stack: (L, D); pattern: (D,) -> (B,) f32."""
    B, D = x.shape
    L = wt_stack.shape[0]

    # Batch tile: fill the MXU rows for realistic B, stay tight for tiny B.
    TB = min(256, _round_up(B, 8))
    B_pad = _round_up(B, TB)
    if B_pad != B:
        x = jnp.pad(x, ((0, B_pad - B), (0, 0)))

    x = x.astype(jnp.float32)
    wt = wt_stack.astype(weights_dtype)               # stream weights in bf16
    b3 = b_stack.astype(jnp.float32).reshape(L, 1, D)
    p2 = pattern.astype(jnp.float32).reshape(1, D)

    w_itemsize = jnp.dtype(weights_dtype).itemsize
    # Per-step VMEM footprint (double-buffered inputs + persistent scratch).
    vmem_need = (
        2 * D * D * w_itemsize        # weight double-buffer
        + 2 * TB * D * 4              # x input blocks
        + 2 * 1 * D * 4               # bias blocks
        + 2 * 1 * D * 4               # pattern blocks
        + 2 * TB * 1 * 4              # output blocks
        + TB * D * 4                  # activation scratch
    )
    vmem_limit = int(min(2 * vmem_need + (4 << 20), 96 << 20))

    cost = pl.CostEstimate(
        flops=2 * L * B_pad * D * D + 2 * B_pad * D,
        transcendentals=0,
        bytes_accessed=L * D * D * w_itemsize + L * D * 4 + B_pad * D * 4
        + B_pad * 4 + D * 4,
    )

    grid_spec = pltpu.PrefetchScalarGridSpec(
        num_scalar_prefetch=0,
        grid=(B_pad // TB, L),
        in_specs=[
            pl.BlockSpec((TB, D), lambda b, l: (b, 0)),                    # x
            pl.BlockSpec((pl.Squeezed(), D, D), lambda b, l: (l, 0, 0)),   # W.T per layer
            pl.BlockSpec((pl.Squeezed(), 1, D), lambda b, l: (l, 0, 0)),   # bias per layer
            pl.BlockSpec((1, D), lambda b, l: (0, 0)),                     # pattern row
        ],
        out_specs=pl.BlockSpec((TB, 1), lambda b, l: (b, 0)),
        scratch_shapes=[pltpu.VMEM((TB, D), jnp.float32)],
    )

    out = pl.pallas_call(
        emergence_kernel,
        out_shape=jax.ShapeDtypeStruct((B_pad, 1), jnp.float32),
        grid_spec=grid_spec,
        compiler_params=pltpu.CompilerParams(
            dimension_semantics=("parallel", "arbitrary"),
            vmem_limit_bytes=vmem_limit,
        ),
        cost_estimate=cost,
    )(x, wt, b3, p2)
    return out[:B, 0]


def _init_params(key, dim, num_layers=NUM_LAYERS):
    """Deterministic synthetic init mimicking nn.Linear default ranges."""
    kw, kb, kp = jax.random.split(key, 3)
    bound = 1.0 / jnp.sqrt(dim)
    # W_l has torch shape (out=dim, in=dim); store W.T stacked for x @ W.T.
    w = jax.random.uniform(kw, (num_layers, dim, dim), jnp.float32, -bound, bound)
    wt_stack = jnp.transpose(w, (0, 2, 1))
    b_stack = jax.random.uniform(kb, (num_layers, dim), jnp.float32, -bound, bound)
    pattern = jax.random.uniform(kp, (dim,), jnp.float32, 0.0, 1.0)  # torch.rand
    return wt_stack, b_stack, pattern


def _reference(x, wt_stack, b_stack, pattern, weights_dtype=jnp.bfloat16):
    """Pure-JAX reference with identical bf16-weight / f32-accumulate numerics."""
    h = x.astype(jnp.float32)
    wt = wt_stack.astype(weights_dtype)
    for l in range(wt_stack.shape[0]):
        y = jnp.dot(h.astype(weights_dtype), wt[l], preferred_element_type=jnp.float32)
        h = jnp.maximum(y + b_stack[l].astype(jnp.float32), 0.0)
    return jnp.sum(h * pattern.astype(jnp.float32)[None, :], axis=-1)


if __name__ == "__main__":
    B, D = 8, 128
    key = jax.random.PRNGKey(0)
    kx, kparams = jax.random.split(key)
    x = jax.random.normal(kx, (B, D), jnp.float32)
    wt_stack, b_stack, pattern = _init_params(kparams, D)

    out = emergence_patterns(x, wt_stack, b_stack, pattern)
    out = jax.block_until_ready(out)

    ref = _reference(x, wt_stack, b_stack, pattern)
    assert out.shape == (B,)
    assert jnp.allclose(out, ref, rtol=1e-2, atol=1e-2), (out, ref)
    print("KERNEL_OK")
</pallas_src>

<mosaic_0001>
module attributes {stable_mosaic.version = 11 : i64} {
  func.func @emergence_kernel(%arg0: i32, %arg1: i32, %arg2: memref<8x128xf32, #tpu.memory_space<vmem>>, %arg3: memref<1x128x128xbf16, #tpu.memory_space<vmem>>, %arg4: memref<1x1x128xf32, #tpu.memory_space<vmem>>, %arg5: memref<1x128xf32, #tpu.memory_space<vmem>>, %arg6: memref<8x1xf32, #tpu.memory_space<vmem>>, %arg7: memref<8x128xf32, #tpu.memory_space<vmem>>) attributes {dimension_semantics = [#tpu.dimension_semantics<parallel>, #tpu.dimension_semantics<arbitrary>], iteration_bounds = array<i64: 1, 5>, scalar_prefetch = 0 : i64, scratch_operands = 1 : i64, tpu.core_type = #tpu.core_type<tc>, window_params = [{transform_indices = @transform_0, window_bounds = array<i64: 8, 128>}, {transform_indices = @transform_1, window_bounds = array<i64: 1, 128, 128>}, {transform_indices = @transform_2, window_bounds = array<i64: 1, 1, 128>}, {pipeline_mode = #tpu.pipeline_mode<synchronous>, transform_indices = @transform_3, window_bounds = array<i64: 1, 128>}, {transform_indices = @transform_4, window_bounds = array<i64: 8, 1>}]} {
    %c0_i32 = arith.constant 0 : i32
    %0 = arith.cmpi eq, %arg1, %c0_i32 : i32
    %1 = arith.extui %0 : i1 to i32
    %c0_i32_0 = arith.constant 0 : i32
    %2 = arith.cmpi ne, %1, %c0_i32_0 : i32
    scf.if %2 {
      %c0_12 = arith.constant 0 : index
      %c0_13 = arith.constant 0 : index
      %18 = vector.load %arg2[%c0_12, %c0_13] : memref<8x128xf32, #tpu.memory_space<vmem>>, vector<8x128xf32>
      %c0_14 = arith.constant 0 : index
      %c0_15 = arith.constant 0 : index
      %19 = vector.load %arg7[%c0_14, %c0_15] : memref<8x128xf32, #tpu.memory_space<vmem>>, vector<8x128xf32>
      tpu.vector_store %arg7[%c0_14, %c0_15], %18 {strides = array<i32>} : memref<8x128xf32, #tpu.memory_space<vmem>>, vector<8x128xf32>,
    } else {
    }
    %c0 = arith.constant 0 : index
    %c0_1 = arith.constant 0 : index
    %3 = vector.load %arg7[%c0, %c0_1] : memref<8x128xf32, #tpu.memory_space<vmem>>, vector<8x128xf32>
    %4 = arith.truncf %3 : vector<8x128xf32> to vector<8x128xbf16>
    %c0_2 = arith.constant 0 : index
    %c0_3 = arith.constant 0 : index
    %c0_4 = arith.constant 0 : index
    %5 = vector.load %arg3[%c0_2, %c0_3, %c0_4] : memref<1x128x128xbf16, #tpu.memory_space<vmem>>, vector<1x128x128xbf16>
    %6 = vector.shape_cast %5 : vector<1x128x128xbf16> to vector<128x128xbf16>
    %cst = arith.constant dense<0.000000e+00> : vector<8x128xf32>
    %7 = tpu.matmul %4, %6, %cst {dimension_numbers = #tpu.dot_dimension_numbers<[1], [0], [0], [1], [0, 0, 1, 1], [], []>} : vector<8x128xbf16>, vector<128x128xbf16>, vector<8x128xf32> -> vector<8x128xf32>
    %c0_5 = arith.constant 0 : index
    %c0_6 = arith.constant 0 : index
    %c0_7 = arith.constant 0 : index
    %8 = vector.load %arg4[%c0_5, %c0_6, %c0_7] : memref<1x1x128xf32, #tpu.memory_space<vmem>>, vector<1x1x128xf32>
    %9 = vector.shape_cast %8 : vector<1x1x128xf32> to vector<1x128xf32>
    %10 = vector.broadcast %9 : vector<1x128xf32> to vector<8x128xf32>
    %11 = arith.addf %7, %10 : vector<8x128xf32>
    %cst_8 = arith.constant 0.000000e+00 : f32
    %12 = vector.broadcast %cst_8 : f32 to vector<8x128xf32>
    %13 = arith.maximumf %11, %12 : vector<8x128xf32>
    %c0_9 = arith.constant 0 : index
    %c0_10 = arith.constant 0 : index
    %14 = vector.load %arg7[%c0_9, %c0_10] : memref<8x128xf32, #tpu.memory_space<vmem>>, vector<8x128xf32>
    tpu.vector_store %arg7[%c0_9, %c0_10], %13 {strides = array<i32>} : memref<8x128xf32, #tpu.memory_space<vmem>>, vector<8x128xf32>,
    %c4_i32 = arith.constant 4 : i32
    %15 = arith.cmpi eq, %arg1, %c4_i32 : i32
    %16 = arith.extui %15 : i1 to i32
    %c0_i32_11 = arith.constant 0 : i32
    %17 = arith.cmpi ne, %16, %c0_i32_11 : i32
    scf.if %17 {
      %c0_12 = arith.constant 0 : index
      %c0_13 = arith.constant 0 : index
      %18 = vector.load %arg7[%c0_12, %c0_13] : memref<8x128xf32, #tpu.memory_space<vmem>>, vector<8x128xf32>
      %c0_14 = arith.constant 0 : index
      %c0_15 = arith.constant 0 : index
      %19 = vector.load %arg5[%c0_14, %c0_15] : memref<1x128xf32, #tpu.memory_space<vmem>>, vector<1x128xf32>
      %20 = vector.broadcast %19 : vector<1x128xf32> to vector<8x128xf32>
      %21 = arith.mulf %18, %20 : vector<8x128xf32>
      %cst_16 = arith.constant dense<0.000000e+00> : vector<8xf32>
      %22 = vector.multi_reduction <add>, %21, %cst_16 [1] : vector<8x128xf32> to vector<8xf32>
      %23 = vector.shape_cast %22 : vector<8xf32> to vector<8x1xf32>
      %c0_17 = arith.constant 0 : index
      %c0_18 = arith.constant 0 : index
      %24 = vector.load %arg6[%c0_17, %c0_18] : memref<8x1xf32, #tpu.memory_space<vmem>>, vector<8x1xf32>
      tpu.vector_store %arg6[%c0_17, %c0_18], %23 {strides = array<i32>} : memref<8x1xf32, #tpu.memory_space<vmem>>, vector<8x1xf32>,
    } else {
    }
    return
  }
  func.func @transform_0(%arg0: i32, %arg1: i32) -> (i32, i32) {
    %c0_i32 = arith.constant 0 : i32
    %c0_i32_0 = arith.constant 0 : i32
    return %arg0, %c0_i32 : i32, i32
  }
  func.func @transform_1(%arg0: i32, %arg1: i32) -> (i32, i32, i32) {
    %c0_i32 = arith.constant 0 : i32
    %c0_i32_0 = arith.constant 0 : i32
    %c0_i32_1 = arith.constant 0 : i32
    return %arg1, %c0_i32, %c0_i32_0 : i32, i32, i32
  }
  func.func @transform_2(%arg0: i32, %arg1: i32) -> (i32, i32, i32) {
    %c0_i32 = arith.constant 0 : i32
    %c0_i32_0 = arith.constant 0 : i32
    %c0_i32_1 = arith.constant 0 : i32
    return %arg1, %c0_i32, %c0_i32_0 : i32, i32, i32
  }
  func.func @transform_3(%arg0: i32, %arg1: i32) -> (i32, i32) {
    %c0_i32 = arith.constant 0 : i32
    %c0_i32_0 = arith.constant 0 : i32
    %c0_i32_1 = arith.constant 0 : i32
    return %c0_i32, %c0_i32_0 : i32, i32
  }
  func.func @transform_4(%arg0: i32, %arg1: i32) -> (i32, i32) {
    %c0_i32 = arith.constant 0 : i32
    %c0_i32_0 = arith.constant 0 : i32
    return %arg0, %c0_i32 : i32, i32
  }
}

</mosaic_0001>

<bundles_post_ra>
// kernel: emergence_patterns.1
= control target key start
LH: loop header
LB: loop body
LE: loop exit
PB: predicated region body
PF: predicated region fallthrough
CT: control target
= control target key end

     0   :  { %s598_s15 = smov 0   ;;  %s600_s16 = smov 0   ;;  %s655_s0 = inlined_call_operand.vmem [shape: f32[8,128], index: 0, kind: input, shape index: {}]   ;;  %s656_s1 = inlined_call_operand.vmem [shape: bf16[5,128,128], index: 1, kind: input, shape index: {}]   ;;  %s657_s2 = inlined_call_operand.vmem [shape: f32[5,1,128], index: 2, kind: input, shape index: {}]   ;;  %s658_s3 = inlined_call_operand.vmem [shape: f32[1,128], index: 3, kind: input, shape index: {}]   ;;  %s659_s4 = inlined_call_operand.vmem [shape: f32[8,1], index: 4, kind: output, shape index: {}]  }
   0x1   :  { %s602_s17 = smov 0  }
   0x2 LB: > { %s23_s18 = sadd.s32 1, %s565_s16  ;;  %p465_p0 = scmp.ge.s32.totalorder %s569_s17, 1  ;;  %s569_s17 = sphi %s602_s17, %s14_s17   ;;  %s565_s16 = sphi %s600_s16, %s661_s16   ;;  %s561_s15 = sphi %s598_s15, %s660_s15  }
   0x3   : > { %p24_p1 = scmp.ge.s32.totalorder %s23_s18, 5  ;;  %p191_p2 = scmp.lt.s32.totalorder %s569_s17, 6 }
   0x5   : > { %s663_s18 = smov (%p24_p1, %s23_s18), 0  ;;  %p192_p3 = pnand %p465_p0, %p191_p2 }
   0x6   : > { %p227_p4 = scmp.lt.s32.totalorder (!%p192_p3), %s561_s15, 4  ;;  %p468_p5 = scmp.ne.s32.totalorder (!%p192_p3), %s561_s15, 0 }
   0x7   : > { %195 = sbr.rel (%p192_p3) target bundleno = 424 (0x1a8), region = 36 }
   0xe   : > { %s620_s19 = scalar_select %p227_p4, %s561_s15, 4 }
   0xf   : > { %243 = sbr.rel (%p468_p5) target bundleno = 22 (0x16), region = 40  ;;  %v244_v0 = vld [vmem:[%s655_s0] sm:$0xff] (!%p468_p5) }
  0x10   : > { %s483_s20 = sshll.u32 %s620_s19, 6  ;;  %s234_s23 = scalar_lea.vmem %s657_s2, %s620_s19  ;;  %245 = vst [vmem:[#allocation2] sm:$0xff] (!%p468_p5), %v244_v0 }
  0x11   : > { %s231_s26 = scalar_lea.vmem %s656_s1, %s483_s20 }
  0x16 PF: > { %v539_v1 = vld [vmem:[%s231_s26] sm:$0xff]   ;;  %v571_v2 = vmov 0.0   ;;  %v540_v3 = vld [vmem:[%s231_s26 + $0x8] sm:$0xff]   ;;  %vm572_vm0 = vmmov 0   ;;  %v541_v4 = vld [vmem:[%s231_s26 + $0x10] sm:$0xff]   ;;  %p478_p6 = scmp.ne.s32.totalorder %s561_s15, 4 }
  0x17   : > { %493 = vmatprep.subr.bf16.mxu0 %v571_v2  ;;  %509 = vmatprep.mubr.msk.bf16.mxu0 %vm572_vm0, %v571_v2  ;;  %v542_v5 = vld [vmem:[%s231_s26 + $0x18] sm:$0xff]   ;;  %v543_v6 = vld [vmem:[%s231_s26 + $0x20] sm:$0xff]   ;;  %v544_v7 = vld [vmem:[%s231_s26 + $0x28] sm:$0xff]   ;;  %vm376_vm1 = vcmask (!%p478_p6), 7168  }
  0x18   : > { %494 = vmatpush3.bf16.msra.mxu0 %v539_v1  ;;  %v545_v8 = vld [vmem:[%s231_s26 + $0x30] sm:$0xff]   ;;  %v546_v9 = vld [vmem:[%s231_s26 + $0x38] sm:$0xff]   ;;  %v246_v10 = vld [vmem:[#allocation2] sm:$0xff] }
  0x19   : > { %495 = vmatprep.subr.bf16.mxu0 %v571_v2  ;;  %v247_v11 = vpack.c.bf16 %v246_v10, %v246_v10  ;;  %v469_v12 = vld [vmem:[%s234_s23] ss:$0 sm:$0xff] }
  0x1a   : > { %v479_v20 = vld [vmem:[%s658_s3] ss:$0 sm:$0xff] (!%p478_p6) }
  0x1c   : > { %496 = vmatpush3.bf16.msra.mxu0 %v540_v3 }
  0x1d   : > { %497 = vmatprep.subr.bf16.mxu0 %v571_v2 }
  0x20   : > { %498 = vmatpush3.bf16.msra.mxu0 %v541_v4 }
  0x21   : > { %499 = vmatprep.subr.bf16.mxu0 %v571_v2 }
  0x24   : > { %500 = vmatpush3.bf16.msra.mxu0 %v542_v5 }
  0x25   : > { %501 = vmatprep.subr.bf16.mxu0 %v571_v2 }
  0x28   : > { %502 = vmatpush3.bf16.msra.mxu0 %v543_v6 }
  0x29   : > { %503 = vmatprep.subr.bf16.mxu0 %v571_v2 }
  0x2c   : > { %504 = vmatpush3.bf16.msra.mxu0 %v544_v7 }
  0x2d   : > { %505 = vmatprep.subr.bf16.mxu0 %v571_v2 }
  0x30   : > { %506 = vmatpush3.bf16.msra.mxu0 %v545_v8 }
  0x31   : > { %507 = vmatprep.subr.bf16.mxu0 %v571_v2 }
  0x34   : > { %508 = vmatpush3.bf16.msra.mxu0 %v546_v9 }
  0x37   : > { %510 = vmatmul.mubr.bf16.vlgmr.msra.gmra.mrb[0].mxu0 %v247_v11 }
 0x109   : > { %364 = sbr.rel (%p478_p6) target bundleno = 424 (0x1a8), region = 44 }
 0x10a   : > { %v353_v13 = vpop.f32.mrb[0].mxu0 }
 0x10b   : > { %v354_v14 = vadd.f32 %v469_v12, %v353_v13  ;;  %v511_v15 = vpop.f32.mrb[1].mxu0 }
 0x10c   : > { %v356_v16 = vpop.f32.mrb[2].mxu0 }
 0x10d   : > { %v359_v17 = vmax.f32 %v354_v14, 0.0  ;;  %v512_v18 = vpop.f32.mrb[3].mxu0 }
 0x10f   : > { %360 = vst [vmem:[#allocation2] sm:$0xff] %v359_v17 }
 0x116   : > { %v365_v19 = vld [vmem:[#allocation2] sm:$0xff] }
 0x117   : > { %v373_v21 = vmul.f32 %v479_v20, %v365_v19 }
 0x119   : > { %374 = vadd.xlane.f32.xlu0 %v373_v21 }
 0x1a6   : > { %v375_v22 = vpop.xlane.xlu0 %374 }
 0x1a7   : > { %377 = vst.msk [vmem:[%s659_s4] sm:$0xff] %vm376_vm1, %v375_v22 }
 0x1a8 PF: > { %s14_s17 = sadd.s32 1, %s569_s17   ;;  %s660_s15 = smov %s565_s16 }
 0x1a9   : > { %p11_p7 = scmp.ge.s32.totalorder %s14_s17, 7   ;;  %s661_s16 = smov %s663_s18 }
 0x1ab   :  { %13 = sbr.rel (!%p11_p7) target bundleno = 2 (0x2), region = 80 }

</bundles_post_ra>
